<compile_context>
chip_gen: v5e
topology: v5e:2x2
jax: 0.10.0
libtpu: 0.0.40
codegen_flags: <defaults>
</compile_context>

<pallas_src>
import math
from functools import partial

import jax
import jax.numpy as jnp
from jax.experimental import pallas as pl
from jax.experimental.pallas import tpu as pltpu

SQRT2_INV = 1.0 / math.sqrt(2.0)
LANE = 128            # vreg lane width  -> hidden-dim padding target
SUBLANE = 8           # f32 sublane count -> batch-tile alignment
NUM_PARALLEL_TILES = 2  # v7x has 2 TensorCores; >=2 grid steps feeds both.


def _round_up(n, m):
    return (n + m - 1) // m * m


# --------------------------------------------------------------------------
# Fused Pallas kernel: all residual blocks + optional Scale/Tanh/ReLU epilogue
# --------------------------------------------------------------------------
def _fused_resnet_kernel(x_ref, *refs, n_blocks, n_layers,
                         use_scale, use_tanh, use_relu):
    """out = finalize( resblock_{n-1}( ... resblock_0(x) ... ) )

    refs = (beta_00, wT_00, b_00, ..., beta, wT, b, [scale], out_ref)
      beta : (1, d_in)      per-feature swish beta            (f32)
      wT   : (d_in, d_out)  mask*weight, pre-transposed       (bf16, pre-cast)
      b    : (1, d_out)                                       (f32)
    Hidden dims are padded to 128 lanes with zero weight rows/cols and zero
    bias lanes, so padded hidden lanes stay exactly zero.  The external
    feature / residual stream stays at native width.
    """
    out_ref = refs[-1]
    param_refs = refs[:-1]
    n_layer_params = n_blocks * n_layers * 3
    scale_ref = param_refs[n_layer_params] if use_scale else None

    x = x_ref[...]                       # (tile_b, feat) float32
    idx = 0
    # Fully unrolled (small static config).
    # TODO(synk): for large n_blocks/n_layers wrap the layer body in
    # lax.fori_loop so Mosaic bounds live ranges (v5e vst-slot/spill concern).
    for _ in range(n_blocks):
        h = x
        for _ in range(n_layers):
            beta = param_refs[idx][...]
            w = param_refs[idx + 1][...]
            bias = param_refs[idx + 2][...]
            idx += 3
            # Swish with learnable per-feature beta: exp and the approximate
            # reciprocal both run on the EUP slot (frees VALU slots).
            h = h * pl.reciprocal(1.0 + jnp.exp(-beta * h), approx=True)
            # Masked linear: mask folded into w, w pre-cast to bf16 at setup;
            # only the activation is cast here; accumulate in f32 on the MXU.
            h = jnp.dot(h.astype(w.dtype), w,
                        preferred_element_type=jnp.float32) + bias
        x = (x + h) * SQRT2_INV
    if use_scale:
        x = x * scale_ref[...]
    if use_tanh:
        x = jnp.tanh(x)
    if use_relu:
        x = jnp.maximum(x, 0.0)
    out_ref[...] = x


# --------------------------------------------------------------------------
# pallas_call wrapper (single fused launch, ragged batch grid)
# --------------------------------------------------------------------------
def _choose_batch_tile(B, batch_tile):
    """Sublane-aligned batch tile <= B, with >= NUM_PARALLEL_TILES grid steps
    whenever B allows (so both v7x TensorCores get work), and balanced tiles
    so the ragged tail is small."""
    if B <= SUBLANE:
        return B                          # single full-dim tile (block == dim)
    n_tiles = max(NUM_PARALLEL_TILES, pl.cdiv(B, batch_tile))
    tile_b = _round_up(pl.cdiv(B, n_tiles), SUBLANE)
    return max(SUBLANE, min(tile_b, (B // SUBLANE) * SUBLANE))


def masked_resnet_forward(x, kernel_params, final_tanh, final_relu, *,
                          batch_tile=1024):
    blocks = kernel_params["blocks"]
    scale = kernel_params["scale"]
    feat = kernel_params["feat"]

    B, F = x.shape
    assert F == feat
    use_scale = scale is not None
    n_blocks = len(blocks)
    n_layers = len(blocks[0])

    flat_params = []
    for layer in blocks:
        for beta, w_t, bias in layer:
            flat_params.extend([beta, w_t, bias])
    if use_scale:
        flat_params.append(scale)

    tile_b = _choose_batch_tile(B, batch_tile)
    # Ragged last tile: rows past B are never mixed into valid rows (no
    # cross-row reduction) and their output writes are masked out.
    grid = (pl.cdiv(B, tile_b),)

    x = x.astype(jnp.float32)
    act_spec = pl.BlockSpec((tile_b, feat), lambda i: (i, 0))

    kernel = partial(_fused_resnet_kernel,
                     n_blocks=n_blocks, n_layers=n_layers,
                     use_scale=use_scale, use_tanh=final_tanh,
                     use_relu=final_relu)

    def launch(param_pipeline_mode):
        if param_pipeline_mode is None:
            param_specs = [pl.BlockSpec(p.shape, lambda i: (0, 0))
                           for p in flat_params]
        else:
            # Constant index_map -> the block never changes across grid steps;
            # single-buffer the VMEM-resident params to halve their footprint.
            param_specs = [pl.BlockSpec(p.shape, lambda i: (0, 0),
                                        pipeline_mode=param_pipeline_mode)
                           for p in flat_params]
        return pl.pallas_call(
            kernel,
            out_shape=jax.ShapeDtypeStruct((B, feat), jnp.float32),
            grid=grid,
            in_specs=[act_spec] + param_specs,
            out_specs=pl.BlockSpec((tile_b, feat), lambda i: (i, 0)),
            compiler_params=pltpu.CompilerParams(
                dimension_semantics=("parallel",),     # shard batch tiles across TCs
                vmem_limit_bytes=32 * 1024 * 1024),    # safe on v5e/v6e/v7x
        )(x, *flat_params)

    if hasattr(pl, "Buffered"):
        try:
            return launch(pl.Buffered(1))
        except Exception:
            pass                # fall back to default double-buffered params
    return launch(None)


# --------------------------------------------------------------------------
# Parameter construction (mirrors MaskedResNet.__init__ / build_linear)
# --------------------------------------------------------------------------
def _make_mask(in_ch, out_ch, width, exclusive):
    base = jnp.ones((width, width), jnp.float32)
    if exclusive:
        base = 1.0 - jnp.triu(base)       # strictly lower triangular
    else:
        base = jnp.tril(base)             # lower triangular incl. diagonal
    return jnp.tile(base, (out_ch, in_ch))   # (out_ch*width, in_ch*width)


def init_masked_resnet_params(key, num_res_blocks, channels, width,
                              final_scale):
    """Raw (unpadded, f32) parameters mirroring the PyTorch init."""
    assert channels[0] == channels[-1]
    blocks = []
    for _ in range(num_res_blocks):
        layers = []
        for i in range(len(channels) - 1):
            in_ch, out_ch = channels[i], channels[i + 1]
            d_in, d_out = in_ch * width, out_ch * width
            exclusive = (i == 0)

            mask = _make_mask(in_ch, out_ch, width, exclusive)
            bound = math.sqrt(2.81 * 3.0 / (in_ch * width))
            key, wkey = jax.random.split(key)
            w = jax.random.uniform(wkey, (d_out, d_in), jnp.float32,
                                   minval=-bound, maxval=bound)
            # weight.data *= sqrt((mask + eps) / (mask.mean(dim=1, kd) + eps))
            w = w * jnp.sqrt((mask + 1e-7) /
                             (jnp.mean(mask, axis=1, keepdims=True) + 1e-7))
            # TODO(synk): folding the mask into the weights is valid for
            # inference / frozen weights; re-apply after updates if training.
            masked_w_t = (mask * w).T             # (d_in, d_out)
            bias = jnp.zeros((1, d_out), jnp.float32)
            # TODO(synk): Swish/Scale classes are not in the reference source;
            # standard defs assumed: Swish(n) = x*sigmoid(beta*x) with
            # per-feature beta (init 1); Scale(n) = per-feature scale (init 1).
            beta = jnp.ones((1, d_in), jnp.float32)
            layers.append((beta, masked_w_t, bias))
        blocks.append(layers)

    scale = (jnp.ones((1, channels[-1] * width), jnp.float32)
             if final_scale else None)
    return blocks, scale


def prepare_params_for_kernel(blocks, scale, weight_dtype=jnp.bfloat16):
    """Pad *hidden* dims to 128 lanes and pre-cast weights to `weight_dtype`.

    External feature dims (network in/out, residual stream) stay at native
    width so activations carry no zero lanes over HBM.  Padded hidden weight
    rows/cols and bias lanes are zero, so padded hidden lanes stay exactly
    zero through swish -> matmul.  Pre-casting the weights to bf16 here
    (instead of per grid step in the kernel) halves their HBM/VMEM footprint
    and feeds the MXU its native dtype.
    """
    n_layers = len(blocks[0])
    feat = blocks[0][0][1].shape[0]          # d_in of first layer
    padded_blocks = []
    for layer in blocks:
        padded_layers = []
        for li, (beta, w_t, bias) in enumerate(layer):
            d_in, d_out = w_t.shape
            d_in_p = d_in if li == 0 else _round_up(d_in, LANE)
            d_out_p = d_out if li == n_layers - 1 else _round_up(d_out, LANE)
            beta_p = jnp.pad(beta, ((0, 0), (0, d_in_p - d_in)),
                             constant_values=1.0)
            w_p = jnp.pad(w_t, ((0, d_in_p - d_in),
                                (0, d_out_p - d_out))).astype(weight_dtype)
            bias_p = jnp.pad(bias, ((0, 0), (0, d_out_p - d_out)))
            padded_layers.append((beta_p, w_p, bias_p))
        padded_blocks.append(padded_layers)
    return {"blocks": padded_blocks, "scale": scale, "feat": feat}


# --------------------------------------------------------------------------
# Pure-JAX reference (mirrors the PyTorch forward op-for-op, unpadded params)
# --------------------------------------------------------------------------
def masked_resnet_reference(x, blocks, scale, final_tanh, final_relu):
    for layer in blocks:
        h = x
        for beta, w_t, b in layer:
            h = h * jax.nn.sigmoid(beta * h)
            h = h @ w_t + b
        x = (x + h) / math.sqrt(2.0)
    if scale is not None:
        x = x * scale
    if final_tanh:
        x = jnp.tanh(x)
    if final_relu:
        x = jnp.maximum(x, 0.0)
    return x


# --------------------------------------------------------------------------
if __name__ == "__main__":
    # Small config consistent with the module:
    #   channels = [4, 8, 4], width = 8  ->  feature dim 32, hidden dim 64
    num_res_blocks = 2
    channels = [4, 8, 4]
    width = 8
    final_scale, final_tanh, final_relu = True, True, False

    batch = 2
    feat = channels[0] * width

    key = jax.random.PRNGKey(0)
    key, xkey, pkey = jax.random.split(key, 3)
    x = jax.random.normal(xkey, (batch, feat), jnp.float32)

    blocks_raw, scale_raw = init_masked_resnet_params(
        pkey, num_res_blocks, channels, width, final_scale)
    kernel_params = prepare_params_for_kernel(blocks_raw, scale_raw,
                                              weight_dtype=jnp.bfloat16)

    out = masked_resnet_forward(x, kernel_params, final_tanh, final_relu,
                                batch_tile=1024)
    out = jax.block_until_ready(out)

    # Reference uses the same bf16-quantized weights (the kernel's default
    # path runs the MXU in bf16); the elementwise chain is f32 in both.
    blocks_ref = [[(beta, wt.astype(jnp.bfloat16).astype(jnp.float32), b)
                   for beta, wt, b in layer] for layer in blocks_raw]
    ref = masked_resnet_reference(x, blocks_ref, scale_raw,
                                  final_tanh, final_relu)

    assert out.shape == (batch, feat) and out.dtype == jnp.float32
    assert jnp.allclose(out, ref, atol=5e-2, rtol=5e-2), "mismatch vs reference"

    print("KERNEL_OK")
</pallas_src>

<mosaic_0001>
module attributes {stable_mosaic.version = 11 : i64} {
  func.func @_fused_resnet_kernel(%arg0: i32, %arg1: memref<2x32xf32, #tpu.memory_space<vmem>>, %arg2: memref<1x32xf32, #tpu.memory_space<vmem>>, %arg3: memref<32x128xbf16, #tpu.memory_space<vmem>>, %arg4: memref<1x128xf32, #tpu.memory_space<vmem>>, %arg5: memref<1x128xf32, #tpu.memory_space<vmem>>, %arg6: memref<128x32xbf16, #tpu.memory_space<vmem>>, %arg7: memref<1x32xf32, #tpu.memory_space<vmem>>, %arg8: memref<1x32xf32, #tpu.memory_space<vmem>>, %arg9: memref<32x128xbf16, #tpu.memory_space<vmem>>, %arg10: memref<1x128xf32, #tpu.memory_space<vmem>>, %arg11: memref<1x128xf32, #tpu.memory_space<vmem>>, %arg12: memref<128x32xbf16, #tpu.memory_space<vmem>>, %arg13: memref<1x32xf32, #tpu.memory_space<vmem>>, %arg14: memref<1x32xf32, #tpu.memory_space<vmem>>, %arg15: memref<2x32xf32, #tpu.memory_space<vmem>>) attributes {dimension_semantics = [#tpu.dimension_semantics<parallel>], iteration_bounds = array<i64: 1>, scalar_prefetch = 0 : i64, scratch_operands = 0 : i64, tpu.core_type = #tpu.core_type<tc>, window_params = [{transform_indices = @transform_0, window_bounds = array<i64: 2, 32>}, {pipeline_mode = #tpu.pipeline_mode<synchronous>, transform_indices = @transform_1, window_bounds = array<i64: 1, 32>}, {pipeline_mode = #tpu.pipeline_mode<synchronous>, transform_indices = @transform_2, window_bounds = array<i64: 32, 128>}, {pipeline_mode = #tpu.pipeline_mode<synchronous>, transform_indices = @transform_3, window_bounds = array<i64: 1, 128>}, {pipeline_mode = #tpu.pipeline_mode<synchronous>, transform_indices = @transform_4, window_bounds = array<i64: 1, 128>}, {pipeline_mode = #tpu.pipeline_mode<synchronous>, transform_indices = @transform_5, window_bounds = array<i64: 128, 32>}, {pipeline_mode = #tpu.pipeline_mode<synchronous>, transform_indices = @transform_6, window_bounds = array<i64: 1, 32>}, {pipeline_mode = #tpu.pipeline_mode<synchronous>, transform_indices = @transform_7, window_bounds = array<i64: 1, 32>}, {pipeline_mode = #tpu.pipeline_mode<synchronous>, transform_indices = @transform_8, window_bounds = array<i64: 32, 128>}, {pipeline_mode = #tpu.pipeline_mode<synchronous>, transform_indices = @transform_9, window_bounds = array<i64: 1, 128>}, {pipeline_mode = #tpu.pipeline_mode<synchronous>, transform_indices = @transform_10, window_bounds = array<i64: 1, 128>}, {pipeline_mode = #tpu.pipeline_mode<synchronous>, transform_indices = @transform_11, window_bounds = array<i64: 128, 32>}, {pipeline_mode = #tpu.pipeline_mode<synchronous>, transform_indices = @transform_12, window_bounds = array<i64: 1, 32>}, {pipeline_mode = #tpu.pipeline_mode<synchronous>, transform_indices = @transform_13, window_bounds = array<i64: 1, 32>}, {transform_indices = @transform_14, window_bounds = array<i64: 2, 32>}]} {
    %c0 = arith.constant 0 : index
    %c0_0 = arith.constant 0 : index
    %0 = vector.load %arg1[%c0, %c0_0] : memref<2x32xf32, #tpu.memory_space<vmem>>, vector<2x32xf32>
    %c0_1 = arith.constant 0 : index
    %c0_2 = arith.constant 0 : index
    %1 = vector.load %arg2[%c0_1, %c0_2] : memref<1x32xf32, #tpu.memory_space<vmem>>, vector<1x32xf32>
    %c0_3 = arith.constant 0 : index
    %c0_4 = arith.constant 0 : index
    %2 = vector.load %arg3[%c0_3, %c0_4] : memref<32x128xbf16, #tpu.memory_space<vmem>>, vector<32x128xbf16>
    %c0_5 = arith.constant 0 : index
    %c0_6 = arith.constant 0 : index
    %3 = vector.load %arg4[%c0_5, %c0_6] : memref<1x128xf32, #tpu.memory_space<vmem>>, vector<1x128xf32>
    %cst = arith.constant 0.000000e+00 : f32
    %4 = vector.broadcast %cst : f32 to vector<1x32xf32>
    %5 = arith.subf %4, %1 : vector<1x32xf32>
    %6 = vector.broadcast %5 : vector<1x32xf32> to vector<2x32xf32>
    %7 = arith.mulf %6, %0 : vector<2x32xf32>
    %8 = math.exp %7 : vector<2x32xf32>
    %cst_7 = arith.constant 1.000000e+00 : f32
    %9 = vector.broadcast %cst_7 : f32 to vector<2x32xf32>
    %10 = arith.addf %9, %8 : vector<2x32xf32>
    %11 = tpu.reciprocal %10 {approx = true} : vector<2x32xf32> -> vector<2x32xf32>
    %12 = arith.mulf %0, %11 : vector<2x32xf32>
    %13 = arith.truncf %12 : vector<2x32xf32> to vector<2x32xbf16>
    %cst_8 = arith.constant dense<0.000000e+00> : vector<2x128xf32>
    %14 = tpu.matmul %13, %2, %cst_8 {dimension_numbers = #tpu.dot_dimension_numbers<[1], [0], [0], [1], [0, 0, 1, 1], [], []>} : vector<2x32xbf16>, vector<32x128xbf16>, vector<2x128xf32> -> vector<2x128xf32>
    %15 = vector.broadcast %3 : vector<1x128xf32> to vector<2x128xf32>
    %16 = arith.addf %14, %15 : vector<2x128xf32>
    %c0_9 = arith.constant 0 : index
    %c0_10 = arith.constant 0 : index
    %17 = vector.load %arg5[%c0_9, %c0_10] : memref<1x128xf32, #tpu.memory_space<vmem>>, vector<1x128xf32>
    %c0_11 = arith.constant 0 : index
    %c0_12 = arith.constant 0 : index
    %18 = vector.load %arg6[%c0_11, %c0_12] : memref<128x32xbf16, #tpu.memory_space<vmem>>, vector<128x32xbf16>
    %c0_13 = arith.constant 0 : index
    %c0_14 = arith.constant 0 : index
    %19 = vector.load %arg7[%c0_13, %c0_14] : memref<1x32xf32, #tpu.memory_space<vmem>>, vector<1x32xf32>
    %cst_15 = arith.constant 0.000000e+00 : f32
    %20 = vector.broadcast %cst_15 : f32 to vector<1x128xf32>
    %21 = arith.subf %20, %17 : vector<1x128xf32>
    %22 = vector.broadcast %21 : vector<1x128xf32> to vector<2x128xf32>
    %23 = arith.mulf %22, %16 : vector<2x128xf32>
    %24 = math.exp %23 : vector<2x128xf32>
    %cst_16 = arith.constant 1.000000e+00 : f32
    %25 = vector.broadcast %cst_16 : f32 to vector<2x128xf32>
    %26 = arith.addf %25, %24 : vector<2x128xf32>
    %27 = tpu.reciprocal %26 {approx = true} : vector<2x128xf32> -> vector<2x128xf32>
    %28 = arith.mulf %16, %27 : vector<2x128xf32>
    %29 = arith.truncf %28 : vector<2x128xf32> to vector<2x128xbf16>
    %cst_17 = arith.constant dense<0.000000e+00> : vector<2x32xf32>
    %30 = tpu.matmul %29, %18, %cst_17 {dimension_numbers = #tpu.dot_dimension_numbers<[1], [0], [0], [1], [0, 0, 1, 1], [], []>} : vector<2x128xbf16>, vector<128x32xbf16>, vector<2x32xf32> -> vector<2x32xf32>
    %31 = vector.broadcast %19 : vector<1x32xf32> to vector<2x32xf32>
    %32 = arith.addf %30, %31 : vector<2x32xf32>
    %33 = arith.addf %0, %32 : vector<2x32xf32>
    %cst_18 = arith.constant 0.707106769 : f32
    %34 = vector.broadcast %cst_18 : f32 to vector<2x32xf32>
    %35 = arith.mulf %33, %34 : vector<2x32xf32>
    %c0_19 = arith.constant 0 : index
    %c0_20 = arith.constant 0 : index
    %36 = vector.load %arg8[%c0_19, %c0_20] : memref<1x32xf32, #tpu.memory_space<vmem>>, vector<1x32xf32>
    %c0_21 = arith.constant 0 : index
    %c0_22 = arith.constant 0 : index
    %37 = vector.load %arg9[%c0_21, %c0_22] : memref<32x128xbf16, #tpu.memory_space<vmem>>, vector<32x128xbf16>
    %c0_23 = arith.constant 0 : index
    %c0_24 = arith.constant 0 : index
    %38 = vector.load %arg10[%c0_23, %c0_24] : memref<1x128xf32, #tpu.memory_space<vmem>>, vector<1x128xf32>
    %cst_25 = arith.constant 0.000000e+00 : f32
    %39 = vector.broadcast %cst_25 : f32 to vector<1x32xf32>
    %40 = arith.subf %39, %36 : vector<1x32xf32>
    %41 = vector.broadcast %40 : vector<1x32xf32> to vector<2x32xf32>
    %42 = arith.mulf %41, %35 : vector<2x32xf32>
    %43 = math.exp %42 : vector<2x32xf32>
    %cst_26 = arith.constant 1.000000e+00 : f32
    %44 = vector.broadcast %cst_26 : f32 to vector<2x32xf32>
    %45 = arith.addf %44, %43 : vector<2x32xf32>
    %46 = tpu.reciprocal %45 {approx = true} : vector<2x32xf32> -> vector<2x32xf32>
    %47 = arith.mulf %35, %46 : vector<2x32xf32>
    %48 = arith.truncf %47 : vector<2x32xf32> to vector<2x32xbf16>
    %cst_27 = arith.constant dense<0.000000e+00> : vector<2x128xf32>
    %49 = tpu.matmul %48, %37, %cst_27 {dimension_numbers = #tpu.dot_dimension_numbers<[1], [0], [0], [1], [0, 0, 1, 1], [], []>} : vector<2x32xbf16>, vector<32x128xbf16>, vector<2x128xf32> -> vector<2x128xf32>
    %50 = vector.broadcast %38 : vector<1x128xf32> to vector<2x128xf32>
    %51 = arith.addf %49, %50 : vector<2x128xf32>
    %c0_28 = arith.constant 0 : index
    %c0_29 = arith.constant 0 : index
    %52 = vector.load %arg11[%c0_28, %c0_29] : memref<1x128xf32, #tpu.memory_space<vmem>>, vector<1x128xf32>
    %c0_30 = arith.constant 0 : index
    %c0_31 = arith.constant 0 : index
    %53 = vector.load %arg12[%c0_30, %c0_31] : memref<128x32xbf16, #tpu.memory_space<vmem>>, vector<128x32xbf16>
    %c0_32 = arith.constant 0 : index
    %c0_33 = arith.constant 0 : index
    %54 = vector.load %arg13[%c0_32, %c0_33] : memref<1x32xf32, #tpu.memory_space<vmem>>, vector<1x32xf32>
    %cst_34 = arith.constant 0.000000e+00 : f32
    %55 = vector.broadcast %cst_34 : f32 to vector<1x128xf32>
    %56 = arith.subf %55, %52 : vector<1x128xf32>
    %57 = vector.broadcast %56 : vector<1x128xf32> to vector<2x128xf32>
    %58 = arith.mulf %57, %51 : vector<2x128xf32>
    %59 = math.exp %58 : vector<2x128xf32>
    %cst_35 = arith.constant 1.000000e+00 : f32
    %60 = vector.broadcast %cst_35 : f32 to vector<2x128xf32>
    %61 = arith.addf %60, %59 : vector<2x128xf32>
    %62 = tpu.reciprocal %61 {approx = true} : vector<2x128xf32> -> vector<2x128xf32>
    %63 = arith.mulf %51, %62 : vector<2x128xf32>
    %64 = arith.truncf %63 : vector<2x128xf32> to vector<2x128xbf16>
    %cst_36 = arith.constant dense<0.000000e+00> : vector<2x32xf32>
    %65 = tpu.matmul %64, %53, %cst_36 {dimension_numbers = #tpu.dot_dimension_numbers<[1], [0], [0], [1], [0, 0, 1, 1], [], []>} : vector<2x128xbf16>, vector<128x32xbf16>, vector<2x32xf32> -> vector<2x32xf32>
    %66 = vector.broadcast %54 : vector<1x32xf32> to vector<2x32xf32>
    %67 = arith.addf %65, %66 : vector<2x32xf32>
    %68 = arith.addf %35, %67 : vector<2x32xf32>
    %cst_37 = arith.constant 0.707106769 : f32
    %69 = vector.broadcast %cst_37 : f32 to vector<2x32xf32>
    %70 = arith.mulf %68, %69 : vector<2x32xf32>
    %c0_38 = arith.constant 0 : index
    %c0_39 = arith.constant 0 : index
    %71 = vector.load %arg14[%c0_38, %c0_39] : memref<1x32xf32, #tpu.memory_space<vmem>>, vector<1x32xf32>
    %72 = vector.broadcast %71 : vector<1x32xf32> to vector<2x32xf32>
    %73 = arith.mulf %70, %72 : vector<2x32xf32>
    %74 = math.tanh %73 : vector<2x32xf32>
    %c0_40 = arith.constant 0 : index
    %c0_41 = arith.constant 0 : index
    %75 = vector.load %arg15[%c0_40, %c0_41] : memref<2x32xf32, #tpu.memory_space<vmem>>, vector<2x32xf32>
    tpu.vector_store %arg15[%c0_40, %c0_41], %74 {strides = array<i32>} : memref<2x32xf32, #tpu.memory_space<vmem>>, vector<2x32xf32>,
    return
  }
  func.func @transform_0(%arg0: i32) -> (i32, i32) {
    %c0_i32 = arith.constant 0 : i32
    %c0_i32_0 = arith.constant 0 : i32
    return %arg0, %c0_i32 : i32, i32
  }
  func.func @transform_1(%arg0: i32) -> (i32, i32) {
    %c0_i32 = arith.constant 0 : i32
    %c0_i32_0 = arith.constant 0 : i32
    %c0_i32_1 = arith.constant 0 : i32
    return %c0_i32, %c0_i32_0 : i32, i32
  }
  func.func @transform_2(%arg0: i32) -> (i32, i32) {
    %c0_i32 = arith.constant 0 : i32
    %c0_i32_0 = arith.constant 0 : i32
    %c0_i32_1 = arith.constant 0 : i32
    return %c0_i32, %c0_i32_0 : i32, i32
  }
  func.func @transform_3(%arg0: i32) -> (i32, i32) {
    %c0_i32 = arith.constant 0 : i32
    %c0_i32_0 = arith.constant 0 : i32
    %c0_i32_1 = arith.constant 0 : i32
    return %c0_i32, %c0_i32_0 : i32, i32
  }
  func.func @transform_4(%arg0: i32) -> (i32, i32) {
    %c0_i32 = arith.constant 0 : i32
    %c0_i32_0 = arith.constant 0 : i32
    %c0_i32_1 = arith.constant 0 : i32
    return %c0_i32, %c0_i32_0 : i32, i32
  }
  func.func @transform_5(%arg0: i32) -> (i32, i32) {
    %c0_i32 = arith.constant 0 : i32
    %c0_i32_0 = arith.constant 0 : i32
    %c0_i32_1 = arith.constant 0 : i32
    return %c0_i32, %c0_i32_0 : i32, i32
  }
  func.func @transform_6(%arg0: i32) -> (i32, i32) {
    %c0_i32 = arith.constant 0 : i32
    %c0_i32_0 = arith.constant 0 : i32
    %c0_i32_1 = arith.constant 0 : i32
    return %c0_i32, %c0_i32_0 : i32, i32
  }
  func.func @transform_7(%arg0: i32) -> (i32, i32) {
    %c0_i32 = arith.constant 0 : i32
    %c0_i32_0 = arith.constant 0 : i32
    %c0_i32_1 = arith.constant 0 : i32
    return %c0_i32, %c0_i32_0 : i32, i32
  }
  func.func @transform_8(%arg0: i32) -> (i32, i32) {
    %c0_i32 = arith.constant 0 : i32
    %c0_i32_0 = arith.constant 0 : i32
    %c0_i32_1 = arith.constant 0 : i32
    return %c0_i32, %c0_i32_0 : i32, i32
  }
  func.func @transform_9(%arg0: i32) -> (i32, i32) {
    %c0_i32 = arith.constant 0 : i32
    %c0_i32_0 = arith.constant 0 : i32
    %c0_i32_1 = arith.constant 0 : i32
    return %c0_i32, %c0_i32_0 : i32, i32
  }
  func.func @transform_10(%arg0: i32) -> (i32, i32) {
    %c0_i32 = arith.constant 0 : i32
    %c0_i32_0 = arith.constant 0 : i32
    %c0_i32_1 = arith.constant 0 : i32
    return %c0_i32, %c0_i32_0 : i32, i32
  }
  func.func @transform_11(%arg0: i32) -> (i32, i32) {
    %c0_i32 = arith.constant 0 : i32
    %c0_i32_0 = arith.constant 0 : i32
    %c0_i32_1 = arith.constant 0 : i32
    return %c0_i32, %c0_i32_0 : i32, i32
  }
  func.func @transform_12(%arg0: i32) -> (i32, i32) {
    %c0_i32 = arith.constant 0 : i32
    %c0_i32_0 = arith.constant 0 : i32
    %c0_i32_1 = arith.constant 0 : i32
    return %c0_i32, %c0_i32_0 : i32, i32
  }
  func.func @transform_13(%arg0: i32) -> (i32, i32) {
    %c0_i32 = arith.constant 0 : i32
    %c0_i32_0 = arith.constant 0 : i32
    %c0_i32_1 = arith.constant 0 : i32
    return %c0_i32, %c0_i32_0 : i32, i32
  }
  func.func @transform_14(%arg0: i32) -> (i32, i32) {
    %c0_i32 = arith.constant 0 : i32
    %c0_i32_0 = arith.constant 0 : i32
    return %arg0, %c0_i32 : i32, i32
  }
}

module attributes {stable_mosaic.version = 11 : i64} {
  func.func @_fused_resnet_kernel(%arg0: i32, %arg1: memref<2x32xf32, #tpu.memory_space<vmem>>, %arg2: memref<1x32xf32, #tpu.memory_space<vmem>>, %arg3: memref<32x128xbf16, #tpu.memory_space<vmem>>, %arg4: memref<1x128xf32, #tpu.memory_space<vmem>>, %arg5: memref<1x128xf32, #tpu.memory_space<vmem>>, %arg6: memref<128x32xbf16, #tpu.memory_space<vmem>>, %arg7: memref<1x32xf32, #tpu.memory_space<vmem>>, %arg8: memref<1x32xf32, #tpu.memory_space<vmem>>, %arg9: memref<32x128xbf16, #tpu.memory_space<vmem>>, %arg10: memref<1x128xf32, #tpu.memory_space<vmem>>, %arg11: memref<1x128xf32, #tpu.memory_space<vmem>>, %arg12: memref<128x32xbf16, #tpu.memory_space<vmem>>, %arg13: memref<1x32xf32, #tpu.memory_space<vmem>>, %arg14: memref<1x32xf32, #tpu.memory_space<vmem>>, %arg15: memref<2x32xf32, #tpu.memory_space<vmem>>) attributes {dimension_semantics = [#tpu.dimension_semantics<parallel>], iteration_bounds = array<i64: 1>, scalar_prefetch = 0 : i64, scratch_operands = 0 : i64, tpu.core_type = #tpu.core_type<tc>, window_params = [{transform_indices = @transform_0, window_bounds = array<i64: 2, 32>}, {pipeline_mode = #tpu.pipeline_mode<synchronous>, transform_indices = @transform_1, window_bounds = array<i64: 1, 32>}, {pipeline_mode = #tpu.pipeline_mode<synchronous>, transform_indices = @transform_2, window_bounds = array<i64: 32, 128>}, {pipeline_mode = #tpu.pipeline_mode<synchronous>, transform_indices = @transform_3, window_bounds = array<i64: 1, 128>}, {pipeline_mode = #tpu.pipeline_mode<synchronous>, transform_indices = @transform_4, window_bounds = array<i64: 1, 128>}, {pipeline_mode = #tpu.pipeline_mode<synchronous>, transform_indices = @transform_5, window_bounds = array<i64: 128, 32>}, {pipeline_mode = #tpu.pipeline_mode<synchronous>, transform_indices = @transform_6, window_bounds = array<i64: 1, 32>}, {pipeline_mode = #tpu.pipeline_mode<synchronous>, transform_indices = @transform_7, window_bounds = array<i64: 1, 32>}, {pipeline_mode = #tpu.pipeline_mode<synchronous>, transform_indices = @transform_8, window_bounds = array<i64: 32, 128>}, {pipeline_mode = #tpu.pipeline_mode<synchronous>, transform_indices = @transform_9, window_bounds = array<i64: 1, 128>}, {pipeline_mode = #tpu.pipeline_mode<synchronous>, transform_indices = @transform_10, window_bounds = array<i64: 1, 128>}, {pipeline_mode = #tpu.pipeline_mode<synchronous>, transform_indices = @transform_11, window_bounds = array<i64: 128, 32>}, {pipeline_mode = #tpu.pipeline_mode<synchronous>, transform_indices = @transform_12, window_bounds = array<i64: 1, 32>}, {pipeline_mode = #tpu.pipeline_mode<synchronous>, transform_indices = @transform_13, window_bounds = array<i64: 1, 32>}, {transform_indices = @transform_14, window_bounds = array<i64: 2, 32>}]} {
    %c0 = arith.constant 0 : index
    %c0_0 = arith.constant 0 : index
    %0 = vector.load %arg1[%c0, %c0_0] : memref<2x32xf32, #tpu.memory_space<vmem>>, vector<2x32xf32>
    %c0_1 = arith.constant 0 : index
    %c0_2 = arith.constant 0 : index
    %1 = vector.load %arg2[%c0_1, %c0_2] : memref<1x32xf32, #tpu.memory_space<vmem>>, vector<1x32xf32>
    %c0_3 = arith.constant 0 : index
    %c0_4 = arith.constant 0 : index
    %2 = vector.load %arg3[%c0_3, %c0_4] : memref<32x128xbf16, #tpu.memory_space<vmem>>, vector<32x128xbf16>
    %c0_5 = arith.constant 0 : index
    %c0_6 = arith.constant 0 : index
    %3 = vector.load %arg4[%c0_5, %c0_6] : memref<1x128xf32, #tpu.memory_space<vmem>>, vector<1x128xf32>
    %cst = arith.constant 0.000000e+00 : f32
    %4 = vector.broadcast %cst : f32 to vector<1x32xf32>
    %5 = arith.subf %4, %1 : vector<1x32xf32>
    %6 = vector.broadcast %5 : vector<1x32xf32> to vector<2x32xf32>
    %7 = arith.mulf %6, %0 : vector<2x32xf32>
    %8 = math.exp %7 : vector<2x32xf32>
    %cst_7 = arith.constant 1.000000e+00 : f32
    %9 = vector.broadcast %cst_7 : f32 to vector<2x32xf32>
    %10 = arith.addf %9, %8 : vector<2x32xf32>
    %11 = tpu.reciprocal %10 {approx = true} : vector<2x32xf32> -> vector<2x32xf32>
    %12 = arith.mulf %0, %11 : vector<2x32xf32>
    %13 = arith.truncf %12 : vector<2x32xf32> to vector<2x32xbf16>
    %cst_8 = arith.constant dense<0.000000e+00> : vector<2x128xf32>
    %14 = tpu.matmul %13, %2, %cst_8 {dimension_numbers = #tpu.dot_dimension_numbers<[1], [0], [0], [1], [0, 0, 1, 1], [], []>} : vector<2x32xbf16>, vector<32x128xbf16>, vector<2x128xf32> -> vector<2x128xf32>
    %15 = vector.broadcast %3 : vector<1x128xf32> to vector<2x128xf32>
    %16 = arith.addf %14, %15 : vector<2x128xf32>
    %c0_9 = arith.constant 0 : index
    %c0_10 = arith.constant 0 : index
    %17 = vector.load %arg5[%c0_9, %c0_10] : memref<1x128xf32, #tpu.memory_space<vmem>>, vector<1x128xf32>
    %c0_11 = arith.constant 0 : index
    %c0_12 = arith.constant 0 : index
    %18 = vector.load %arg6[%c0_11, %c0_12] : memref<128x32xbf16, #tpu.memory_space<vmem>>, vector<128x32xbf16>
    %c0_13 = arith.constant 0 : index
    %c0_14 = arith.constant 0 : index
    %19 = vector.load %arg7[%c0_13, %c0_14] : memref<1x32xf32, #tpu.memory_space<vmem>>, vector<1x32xf32>
    %cst_15 = arith.constant 0.000000e+00 : f32
    %20 = vector.broadcast %cst_15 : f32 to vector<1x128xf32>
    %21 = arith.subf %20, %17 : vector<1x128xf32>
    %22 = vector.broadcast %21 : vector<1x128xf32> to vector<2x128xf32>
    %23 = arith.mulf %22, %16 : vector<2x128xf32>
    %24 = math.exp %23 : vector<2x128xf32>
    %cst_16 = arith.constant 1.000000e+00 : f32
    %25 = vector.broadcast %cst_16 : f32 to vector<2x128xf32>
    %26 = arith.addf %25, %24 : vector<2x128xf32>
    %27 = tpu.reciprocal %26 {approx = true} : vector<2x128xf32> -> vector<2x128xf32>
    %28 = arith.mulf %16, %27 : vector<2x128xf32>
    %29 = arith.truncf %28 : vector<2x128xf32> to vector<2x128xbf16>
    %cst_17 = arith.constant dense<0.000000e+00> : vector<2x32xf32>
    %30 = tpu.matmul %29, %18, %cst_17 {dimension_numbers = #tpu.dot_dimension_numbers<[1], [0], [0], [1], [0, 0, 1, 1], [], []>} : vector<2x128xbf16>, vector<128x32xbf16>, vector<2x32xf32> -> vector<2x32xf32>
    %31 = vector.broadcast %19 : vector<1x32xf32> to vector<2x32xf32>
    %32 = arith.addf %30, %31 : vector<2x32xf32>
    %33 = arith.addf %0, %32 : vector<2x32xf32>
    %cst_18 = arith.constant 0.707106769 : f32
    %34 = vector.broadcast %cst_18 : f32 to vector<2x32xf32>
    %35 = arith.mulf %33, %34 : vector<2x32xf32>
    %c0_19 = arith.constant 0 : index
    %c0_20 = arith.constant 0 : index
    %36 = vector.load %arg8[%c0_19, %c0_20] : memref<1x32xf32, #tpu.memory_space<vmem>>, vector<1x32xf32>
    %c0_21 = arith.constant 0 : index
    %c0_22 = arith.constant 0 : index
    %37 = vector.load %arg9[%c0_21, %c0_22] : memref<32x128xbf16, #tpu.memory_space<vmem>>, vector<32x128xbf16>
    %c0_23 = arith.constant 0 : index
    %c0_24 = arith.constant 0 : index
    %38 = vector.load %arg10[%c0_23, %c0_24] : memref<1x128xf32, #tpu.memory_space<vmem>>, vector<1x128xf32>
    %cst_25 = arith.constant 0.000000e+00 : f32
    %39 = vector.broadcast %cst_25 : f32 to vector<1x32xf32>
    %40 = arith.subf %39, %36 : vector<1x32xf32>
    %41 = vector.broadcast %40 : vector<1x32xf32> to vector<2x32xf32>
    %42 = arith.mulf %41, %35 : vector<2x32xf32>
    %43 = math.exp %42 : vector<2x32xf32>
    %cst_26 = arith.constant 1.000000e+00 : f32
    %44 = vector.broadcast %cst_26 : f32 to vector<2x32xf32>
    %45 = arith.addf %44, %43 : vector<2x32xf32>
    %46 = tpu.reciprocal %45 {approx = true} : vector<2x32xf32> -> vector<2x32xf32>
    %47 = arith.mulf %35, %46 : vector<2x32xf32>
    %48 = arith.truncf %47 : vector<2x32xf32> to vector<2x32xbf16>
    %cst_27 = arith.constant dense<0.000000e+00> : vector<2x128xf32>
    %49 = tpu.matmul %48, %37, %cst_27 {dimension_numbers = #tpu.dot_dimension_numbers<[1], [0], [0], [1], [0, 0, 1, 1], [], []>} : vector<2x32xbf16>, vector<32x128xbf16>, vector<2x128xf32> -> vector<2x128xf32>
    %50 = vector.broadcast %38 : vector<1x128xf32> to vector<2x128xf32>
    %51 = arith.addf %49, %50 : vector<2x128xf32>
    %c0_28 = arith.constant 0 : index
    %c0_29 = arith.constant 0 : index
    %52 = vector.load %arg11[%c0_28, %c0_29] : memref<1x128xf32, #tpu.memory_space<vmem>>, vector<1x128xf32>
    %c0_30 = arith.constant 0 : index
    %c0_31 = arith.constant 0 : index
    %53 = vector.load %arg12[%c0_30, %c0_31] : memref<128x32xbf16, #tpu.memory_space<vmem>>, vector<128x32xbf16>
    %c0_32 = arith.constant 0 : index
    %c0_33 = arith.constant 0 : index
    %54 = vector.load %arg13[%c0_32, %c0_33] : memref<1x32xf32, #tpu.memory_space<vmem>>, vector<1x32xf32>
    %cst_34 = arith.constant 0.000000e+00 : f32
    %55 = vector.broadcast %cst_34 : f32 to vector<1x128xf32>
    %56 = arith.subf %55, %52 : vector<1x128xf32>
    %57 = vector.broadcast %56 : vector<1x128xf32> to vector<2x128xf32>
    %58 = arith.mulf %57, %51 : vector<2x128xf32>
    %59 = math.exp %58 : vector<2x128xf32>
    %cst_35 = arith.constant 1.000000e+00 : f32
    %60 = vector.broadcast %cst_35 : f32 to vector<2x128xf32>
    %61 = arith.addf %60, %59 : vector<2x128xf32>
    %62 = tpu.reciprocal %61 {approx = true} : vector<2x128xf32> -> vector<2x128xf32>
    %63 = arith.mulf %51, %62 : vector<2x128xf32>
    %64 = arith.truncf %63 : vector<2x128xf32> to vector<2x128xbf16>
    %cst_36 = arith.constant dense<0.000000e+00> : vector<2x32xf32>
    %65 = tpu.matmul %64, %53, %cst_36 {dimension_numbers = #tpu.dot_dimension_numbers<[1], [0], [0], [1], [0, 0, 1, 1], [], []>} : vector<2x128xbf16>, vector<128x32xbf16>, vector<2x32xf32> -> vector<2x32xf32>
    %66 = vector.broadcast %54 : vector<1x32xf32> to vector<2x32xf32>
    %67 = arith.addf %65, %66 : vector<2x32xf32>
    %68 = arith.addf %35, %67 : vector<2x32xf32>
    %cst_37 = arith.constant 0.707106769 : f32
    %69 = vector.broadcast %cst_37 : f32 to vector<2x32xf32>
    %70 = arith.mulf %68, %69 : vector<2x32xf32>
    %c0_38 = arith.constant 0 : index
    %c0_39 = arith.constant 0 : index
    %71 = vector.load %arg14[%c0_38, %c0_39] : memref<1x32xf32, #tpu.memory_space<vmem>>, vector<1x32xf32>
    %72 = vector.broadcast %71 : vector<1x32xf32> to vector<2x32xf32>
    %73 = arith.mulf %70, %72 : vector<2x32xf32>
    %74 = math.tanh %73 : vector<2x32xf32>
    %c0_40 = arith.constant 0 : index
    %c0_41 = arith.constant 0 : index
    %75 = vector.load %arg15[%c0_40, %c0_41] : memref<2x32xf32, #tpu.memory_space<vmem>>, vector<2x32xf32>
    tpu.vector_store %arg15[%c0_40, %c0_41], %74 {strides = array<i32>} : memref<2x32xf32, #tpu.memory_space<vmem>>, vector<2x32xf32>,
    return
  }
  func.func @transform_0(%arg0: i32) -> (i32, i32) {
    %c0_i32 = arith.constant 0 : i32
    %c0_i32_0 = arith.constant 0 : i32
    return %arg0, %c0_i32 : i32, i32
  }
  func.func @transform_1(%arg0: i32) -> (i32, i32) {
    %c0_i32 = arith.constant 0 : i32
    %c0_i32_0 = arith.constant 0 : i32
    %c0_i32_1 = arith.constant 0 : i32
    return %c0_i32, %c0_i32_0 : i32, i32
  }
  func.func @transform_2(%arg0: i32) -> (i32, i32) {
    %c0_i32 = arith.constant 0 : i32
    %c0_i32_0 = arith.constant 0 : i32
    %c0_i32_1 = arith.constant 0 : i32
    return %c0_i32, %c0_i32_0 : i32, i32
  }
  func.func @transform_3(%arg0: i32) -> (i32, i32) {
    %c0_i32 = arith.constant 0 : i32
    %c0_i32_0 = arith.constant 0 : i32
    %c0_i32_1 = arith.constant 0 : i32
    return %c0_i32, %c0_i32_0 : i32, i32
  }
  func.func @transform_4(%arg0: i32) -> (i32, i32) {
    %c0_i32 = arith.constant 0 : i32
    %c0_i32_0 = arith.constant 0 : i32
    %c0_i32_1 = arith.constant 0 : i32
    return %c0_i32, %c0_i32_0 : i32, i32
  }
  func.func @transform_5(%arg0: i32) -> (i32, i32) {
    %c0_i32 = arith.constant 0 : i32
    %c0_i32_0 = arith.constant 0 : i32
    %c0_i32_1 = arith.constant 0 : i32
    return %c0_i32, %c0_i32_0 : i32, i32
  }
  func.func @transform_6(%arg0: i32) -> (i32, i32) {
    %c0_i32 = arith.constant 0 : i32
    %c0_i32_0 = arith.constant 0 : i32
    %c0_i32_1 = arith.constant 0 : i32
    return %c0_i32, %c0_i32_0 : i32, i32
  }
  func.func @transform_7(%arg0: i32) -> (i32, i32) {
    %c0_i32 = arith.constant 0 : i32
    %c0_i32_0 = arith.constant 0 : i32
    %c0_i32_1 = arith.constant 0 : i32
    return %c0_i32, %c0_i32_0 : i32, i32
  }
  func.func @transform_8(%arg0: i32) -> (i32, i32) {
    %c0_i32 = arith.constant 0 : i32
    %c0_i32_0 = arith.constant 0 : i32
    %c0_i32_1 = arith.constant 0 : i32
    return %c0_i32, %c0_i32_0 : i32, i32
  }
  func.func @transform_9(%arg0: i32) -> (i32, i32) {
    %c0_i32 = arith.constant 0 : i32
    %c0_i32_0 = arith.constant 0 : i32
    %c0_i32_1 = arith.constant 0 : i32
    return %c0_i32, %c0_i32_0 : i32, i32
  }
  func.func @transform_10(%arg0: i32) -> (i32, i32) {
    %c0_i32 = arith.constant 0 : i32
    %c0_i32_0 = arith.constant 0 : i32
    %c0_i32_1 = arith.constant 0 : i32
    return %c0_i32, %c0_i32_0 : i32, i32
  }
  func.func @transform_11(%arg0: i32) -> (i32, i32) {
    %c0_i32 = arith.constant 0 : i32
    %c0_i32_0 = arith.constant 0 : i32
    %c0_i32_1 = arith.constant 0 : i32
    return %c0_i32, %c0_i32_0 : i32, i32
  }
  func.func @transform_12(%arg0: i32) -> (i32, i32) {
    %c0_i32 = arith.constant 0 : i32
    %c0_i32_0 = arith.constant 0 : i32
    %c0_i32_1 = arith.constant 0 : i32
    return %c0_i32, %c0_i32_0 : i32, i32
  }
  func.func @transform_13(%arg0: i32) -> (i32, i32) {
    %c0_i32 = arith.constant 0 : i32
    %c0_i32_0 = arith.constant 0 : i32
    %c0_i32_1 = arith.constant 0 : i32
    return %c0_i32, %c0_i32_0 : i32, i32
  }
  func.func @transform_14(%arg0: i32) -> (i32, i32) {
    %c0_i32 = arith.constant 0 : i32
    %c0_i32_0 = arith.constant 0 : i32
    return %arg0, %c0_i32 : i32, i32
  }
}

</mosaic_0001>

<bundles_post_ra>
// kernel: tpu_custom_call.1
= control target key start
LH: loop header
LB: loop body
LE: loop exit
PB: predicated region body
PF: predicated region fallthrough
CT: control target
= control target key end

     0   :  { %s684_s0 = inlined_call_operand.vmem [shape: f32[2,32], index: 0, kind: input, shape index: {}]   ;;  %s685_s1 = inlined_call_operand.vmem [shape: f32[1,32], index: 1, kind: input, shape index: {}]   ;;  %s686_s2 = inlined_call_operand.vmem [shape: bf16[32,128], index: 2, kind: input, shape index: {}]   ;;  %s687_s3 = inlined_call_operand.vmem [shape: f32[1,128], index: 3, kind: input, shape index: {}]   ;;  %s688_s4 = inlined_call_operand.vmem [shape: f32[1,128], index: 4, kind: input, shape index: {}]   ;;  %s689_s5 = inlined_call_operand.vmem [shape: bf16[128,32], index: 5, kind: input, shape index: {}]   ;;  %s690_s6 = inlined_call_operand.vmem [shape: f32[1,32], index: 6, kind: input, shape index: {}]   ;;  %s691_s7 = inlined_call_operand.vmem [shape: f32[1,32], index: 7, kind: input, shape index: {}]   ;;  %s692_s8 = inlined_call_operand.vmem [shape: bf16[32,128], index: 8, kind: input, shape index: {}]   ;;  %s693_s9 = inlined_call_operand.vmem [shape: f32[1,128], index: 9, kind: input, shape index: {}]   ;;  %s694_s10 = inlined_call_operand.vmem [shape: f32[1,128], index: 10, kind: input, shape index: {}]   ;;  %s695_s11 = inlined_call_operand.vmem [shape: bf16[128,32], index: 11, kind: input, shape index: {}]   ;;  %s696_s12 = inlined_call_operand.vmem [shape: f32[1,32], index: 12, kind: input, shape index: {}]   ;;  %s697_s13 = inlined_call_operand.vmem [shape: f32[1,32], index: 13, kind: input, shape index: {}]   ;;  %s698_s14 = inlined_call_operand.hbm [shape: f32[2,32], index: 14, kind: output, shape index: {}]  }
   0x1   :  { %v444_v0 = vld [vmem:[%s686_s2 + $0x8] sm:$0xff]  ;;  %v50_v1 = vld [vmem:[%s685_s1] sm:$0x1]  ;;  %v452_v2 = vld [vmem:[%s689_s5 + $0x38] sm:$0xff] }
   0x2   :  { %92 = vmatpush.bf16.msra.mxu0 %v444_v0  ;;  %v443_v3 = vld [vmem:[%s686_s2] sm:$0xff]  ;;  %v56_v5 = vsub.f32 0.0, %v50_v1  ;;  %179 = vmatpush.bf16.msra.mxu1 %v452_v2 }
   0x3   :  { %v49_v4 = vld [vmem:[%s684_s0] sm:$0x3] }
   0x4   :  { %v58_v6 = vperm.slane %v56_v5, 0 }
   0x5   :  { %19 = vsyncpa [#allocation3], 0  ;;  %vm82_vm0 = vcmask 261120   ;;  %v451_v14 = vld [vmem:[%s689_s5 + $0x30] sm:$0xff]  ;;  %v450_v15 = vld [vmem:[%s689_s5 + $0x28] sm:$0xff]  ;;  %s513_s1 = smov [#allocation2]  }
   0x6   :  { %93 = vmatpush.bf16.msra.mxu0 %v443_v3  ;;  %v60_v7 = vmul.f32 %v58_v6, %v49_v4  ;;  %180 = vmatpush.bf16.msra.mxu1 %v451_v14  ;;  %v449_v16 = vld [vmem:[%s689_s5 + $0x20] sm:$0xff]  ;;  %v448_v17 = vld [vmem:[%s689_s5 + $0x18] sm:$0xff]  ;;  %v447_v18 = vld [vmem:[%s689_s5 + $0x10] sm:$0xff]  ;;  %s350_s2 = sshll.u32 %s513_s1, 4  ;;  %s352_s24 = sshll.u32 %s698_s14, 4  ;;  %vm343_vm1 = vcmask 254976   ;;  %s351_s2 = int_to_ptr.vmem [resolvable:$true] %s350_s2  ;;  %s353_s24 = int_to_ptr.hbm [resolvable:$true] %s352_s24 }
   0x7   :  { %v446_v19 = vld [vmem:[%s689_s5 + $0x8] sm:$0xff]  ;;  %v445_v20 = vld [vmem:[%s689_s5] sm:$0xff]  ;;  %v462_v40 = vld [vmem:[%s695_s11 + $0x38] sm:$0xff] }
   0x8   :  { %v61_v8 = vmul.f32 1.442695, %v60_v7  ;;  %v99_v21 = vld [vmem:[%s688_s4] sm:$0x1]  ;;  %v454_v35 = vld [vmem:[%s692_s8 + $0x8] sm:$0xff]  ;;  %322 = vmatpush.bf16.msra.mxu3 %v462_v40  ;;  %v461_v54 = vld [vmem:[%s695_s11 + $0x30] sm:$0xff] }
   0x9   :  { %v117_v22 = vsub.f32 0.0, %v99_v21  ;;  %v464_v23 = vld [vmem:[%s687_s3] ss:$0 sm:$0xff]  ;;  %235 = vmatpush.bf16.msra.mxu2 %v454_v35  ;;  %v460_v55 = vld [vmem:[%s695_s11 + $0x28] sm:$0xff]  ;;  %v458_v57 = vld [vmem:[%s695_s11 + $0x18] sm:$0xff] }
   0xa   :  { %469 = vpow2.f32 %v61_v8  ;;  %181 = vmatpush.bf16.msra.mxu1 %v450_v15  ;;  %v453_v36 = vld [vmem:[%s692_s8] sm:$0xff]  ;;  %v457_v58 = vld [vmem:[%s695_s11 + $0x10] sm:$0xff]  ;;  %v456_v59 = vld [vmem:[%s695_s11 + $0x8] sm:$0xff] }
   0xb   :  { %v119_v24 = vperm.slane %v117_v22, 0  ;;  %v194_v37 = vld [vmem:[%s691_s7] sm:$0x1] }
   0xc   :  { %v465_v38 = vld [vmem:[%s690_s6] ss:$0 sm:$0xff]  ;;  %v200_v39 = vsub.f32 0.0, %v194_v37  ;;  %323 = vmatpush.bf16.msra.mxu3 %v461_v54 }
   0xd   :  { %236 = vmatpush.bf16.msra.mxu2 %v453_v36  ;;  %v459_v56 = vld [vmem:[%s695_s11 + $0x20] sm:$0xff] }
   0xe   :  { %182 = vmatpush.bf16.msra.mxu1 %v449_v16  ;;  %v202_v44 = vperm.slane %v200_v39, 0  ;;  %v455_v60 = vld [vmem:[%s695_s11] sm:$0xff] }
   0xf   :  { %v242_v61 = vld [vmem:[%s694_s10] sm:$0x1] }
  0x10   :  { %v470_v9 = vpop.eup %469  ;;  %324 = vmatpush.bf16.msra.mxu3 %v460_v55  ;;  %v260_v62 = vsub.f32 0.0, %v242_v61  ;;  %v466_v63 = vld [vmem:[%s693_s9] ss:$0 sm:$0xff] }
  0x11   :  { %v63_v10 = vadd.f32 1.0, %v470_v9  ;;  %v468_v15 = vld [vmem:[%s697_s13] ss:$0 sm:$0xff] }
  0x12   :  { %183 = vmatpush.bf16.msra.mxu1 %v448_v17  ;;  %v262_v0 = vperm.slane %v260_v62, 0 }
  0x13   :  { %471 = vrcp.f32 %v63_v10 }
  0x14   :  { %325 = vmatpush.bf16.msra.mxu3 %v459_v56 }
  0x16   :  { %184 = vmatpush.bf16.msra.mxu1 %v447_v18 }
  0x18   :  { %326 = vmatpush.bf16.msra.mxu3 %v458_v57 }
  0x19   :  { %v472_v11 = vpop.eup %471 }
  0x1a   :  { %v65_v12 = vmul.f32 %v472_v11, %v49_v4  ;;  %185 = vmatpush.bf16.msra.mxu1 %v446_v19  ;;  %v467_v11 = vld [vmem:[%s696_s12] ss:$0 sm:$0xff] }
  0x1c   :  { %v66_v13 = vpack.c.bf16 %v65_v12, %v65_v12  ;;  %327 = vmatpush.bf16.msra.mxu3 %v457_v58 }
  0x1e   :  { %369 = vmatmul.msk.bf16.vlgmr.msra.gmra.mxu0 %vm82_vm0, %v66_v13  ;;  %186 = vmatpush.bf16.msra.mxu1 %v445_v20 }
  0x20   :  { %328 = vmatpush.bf16.msra.mxu3 %v456_v59 }
  0x24   :  { %329 = vmatpush.bf16.msra.mxu3 %v455_v60 }
  0x9b   :  { %v95_v25 = vpop.f32.mrf.mxu0 }
  0x9c   :  { %v96_v26 = vadd.f32 %v464_v23, %v95_v25 }
  0x9e   :  { %v121_v27 = vmul.f32 %v119_v24, %v96_v26 }
  0xa0   :  { %v122_v28 = vmul.f32 1.442695, %v121_v27 }
  0xa2   :  { %473 = vpow2.f32 %v122_v28 }
  0xa3   :  { %v97_v29 = vpop.f32.mrf.mxu0 }
  0xa8   :  { %v474_v30 = vpop.eup %473 }
  0xa9   :  { %v124_v31 = vadd.f32 1.0, %v474_v30 }
  0xab   :  { %475 = vrcp.f32 %v124_v31 }
  0xb1   :  { %v476_v32 = vpop.eup %475 }
  0xb2   :  { %v126_v33 = vmul.f32 %v476_v32, %v96_v26 }
  0xb4   :  { %v127_v34 = vpack.c.bf16 %v126_v33, %v126_v33 }
  0xb6   :  { %187 = vmatmul.bf16.vlgmr.msra.gmra.mxu1 %v127_v34 }
 0x133   :  { %v188_v41 = vpop.f32.mrf.mxu1 }
 0x134   :  { %v189_v42 = vadd.f32 %v465_v38, %v188_v41 }
 0x136   :  { %v192_v43 = vadd.f32 %v189_v42, %v49_v4 }
 0x138   :  { %v193_v45 = vmul.f32 0.70710677, %v192_v43 }
 0x13a   :  { %v204_v46 = vmul.f32 %v202_v44, %v193_v45 }
 0x13b   :  { %v190_v47 = vpop.f32.mrf.mxu1 }
 0x13c   :  { %v205_v48 = vmul.f32 1.442695, %v204_v46 }
 0x13e   :  { %477 = vpow2.f32 %v205_v48 }
 0x144   :  { %v478_v49 = vpop.eup %477 }
 0x145   :  { %v207_v50 = vadd.f32 1.0, %v478_v49 }
 0x147   :  { %479 = vrcp.f32 %v207_v50 }
 0x14d   :  { %v480_v51 = vpop.eup %479 }
 0x14e   :  { %v209_v52 = vmul.f32 %v480_v51, %v193_v45 }
 0x150   :  { %v210_v53 = vpack.c.bf16 %v209_v52, %v209_v52 }
 0x152   :  { %410 = vmatmul.msk.bf16.vlgmr.msra.gmra.mxu2 %vm82_vm0, %v210_v53 }
 0x1d5   :  { %v238_v1 = vpop.f32.mrf.mxu2 }
 0x1d6   :  { %v239_v2 = vadd.f32 %v466_v63, %v238_v1 }
 0x1d8   :  { %v264_v3 = vmul.f32 %v262_v0, %v239_v2 }
 0x1da   :  { %v265_v4 = vmul.f32 1.442695, %v264_v3 }
 0x1dc   :  { %481 = vpow2.f32 %v265_v4 }
 0x1dd   :  { %v240_v5 = vpop.f32.mrf.mxu2 }
 0x1e2   :  { %v482_v6 = vpop.eup %481 }
 0x1e3   :  { %v267_v7 = vadd.f32 1.0, %v482_v6 }
 0x1e5   :  { %483 = vrcp.f32 %v267_v7 }
 0x1eb   :  { %v484_v8 = vpop.eup %483 }
 0x1ec   :  { %v269_v9 = vmul.f32 %v484_v8, %v239_v2 }
 0x1ee   :  { %v270_v10 = vpack.c.bf16 %v269_v9, %v269_v9 }
 0x1f0   :  { %330 = vmatmul.bf16.vlgmr.msra.gmra.mxu3 %v270_v10 }
 0x273   :  { %v331_v12 = vpop.f32.mrf.mxu3 }
 0x274   :  { %v332_v13 = vadd.f32 %v467_v11, %v331_v12 }
 0x276   :  { %v335_v14 = vadd.f32 %v332_v13, %v193_v45 }
 0x278   :  { %v336_v16 = vmul.f32 0.70710677, %v335_v14 }
 0x27a   :  { %v341_v17 = vmul.f32 %v468_v15, %v336_v16 }
 0x27b   :  { %v333_v18 = vpop.f32.mrf.mxu3 }
 0x27c   :  { %485 = vtanh.f32 %v341_v17 }
 0x282   :  { %v486_v19 = vpop.eup %485 }
 0x283   :  { %344 = vst.msk [vmem:[#allocation2] sm:$0x3] %vm343_vm1, %v486_v19 }
 0x284   :  { %355 = dma.vmem_to_hbm [thread:$0]  %s351_s2, 32, %s353_s24, [#allocation3]  }
 0x285   :  { %511 = dma.done.wait [#allocation3], 32  }
 0x286   :  { %512 = vsyncadd [#allocation3], 4294967264 }
 0x287   :  { %360 = vsyncpa [#allocation3], 1 }

// kernel: tpu_custom_call.1
= control target key start
LH: loop header
LB: loop body
LE: loop exit
PB: predicated region body
PF: predicated region fallthrough
CT: control target
= control target key end

     0   :  { %s684_s0 = inlined_call_operand.vmem [shape: f32[2,32], index: 0, kind: input, shape index: {}]   ;;  %s685_s1 = inlined_call_operand.vmem [shape: f32[1,32], index: 1, kind: input, shape index: {}]   ;;  %s686_s2 = inlined_call_operand.vmem [shape: bf16[32,128], index: 2, kind: input, shape index: {}]   ;;  %s687_s3 = inlined_call_operand.vmem [shape: f32[1,128], index: 3, kind: input, shape index: {}]   ;;  %s688_s4 = inlined_call_operand.vmem [shape: f32[1,128], index: 4, kind: input, shape index: {}]   ;;  %s689_s5 = inlined_call_operand.vmem [shape: bf16[128,32], index: 5, kind: input, shape index: {}]   ;;  %s690_s6 = inlined_call_operand.vmem [shape: f32[1,32], index: 6, kind: input, shape index: {}]   ;;  %s691_s7 = inlined_call_operand.vmem [shape: f32[1,32], index: 7, kind: input, shape index: {}]   ;;  %s692_s8 = inlined_call_operand.vmem [shape: bf16[32,128], index: 8, kind: input, shape index: {}]   ;;  %s693_s9 = inlined_call_operand.vmem [shape: f32[1,128], index: 9, kind: input, shape index: {}]   ;;  %s694_s10 = inlined_call_operand.vmem [shape: f32[1,128], index: 10, kind: input, shape index: {}]   ;;  %s695_s11 = inlined_call_operand.vmem [shape: bf16[128,32], index: 11, kind: input, shape index: {}]   ;;  %s696_s12 = inlined_call_operand.vmem [shape: f32[1,32], index: 12, kind: input, shape index: {}]   ;;  %s697_s13 = inlined_call_operand.vmem [shape: f32[1,32], index: 13, kind: input, shape index: {}]   ;;  %s698_s14 = inlined_call_operand.hbm [shape: f32[2,32], index: 14, kind: output, shape index: {}]  }
   0x1   :  { %v444_v0 = vld [vmem:[%s686_s2 + $0x8] sm:$0xff]  ;;  %v50_v1 = vld [vmem:[%s685_s1] sm:$0x1]  ;;  %v452_v2 = vld [vmem:[%s689_s5 + $0x38] sm:$0xff] }
   0x2   :  { %92 = vmatpush.bf16.msra.mxu0 %v444_v0  ;;  %v443_v3 = vld [vmem:[%s686_s2] sm:$0xff]  ;;  %v56_v5 = vsub.f32 0.0, %v50_v1  ;;  %179 = vmatpush.bf16.msra.mxu1 %v452_v2 }
   0x3   :  { %v49_v4 = vld [vmem:[%s684_s0] sm:$0x3] }
   0x4   :  { %v58_v6 = vperm.slane %v56_v5, 0 }
   0x5   :  { %19 = vsyncpa [#allocation3], 0  ;;  %vm82_vm0 = vcmask 261120   ;;  %v451_v14 = vld [vmem:[%s689_s5 + $0x30] sm:$0xff]  ;;  %v450_v15 = vld [vmem:[%s689_s5 + $0x28] sm:$0xff]  ;;  %s513_s1 = smov [#allocation2]  }
   0x6   :  { %93 = vmatpush.bf16.msra.mxu0 %v443_v3  ;;  %v60_v7 = vmul.f32 %v58_v6, %v49_v4  ;;  %180 = vmatpush.bf16.msra.mxu1 %v451_v14  ;;  %v449_v16 = vld [vmem:[%s689_s5 + $0x20] sm:$0xff]  ;;  %v448_v17 = vld [vmem:[%s689_s5 + $0x18] sm:$0xff]  ;;  %v447_v18 = vld [vmem:[%s689_s5 + $0x10] sm:$0xff]  ;;  %s350_s2 = sshll.u32 %s513_s1, 4  ;;  %s352_s24 = sshll.u32 %s698_s14, 4  ;;  %vm343_vm1 = vcmask 254976   ;;  %s351_s2 = int_to_ptr.vmem [resolvable:$true] %s350_s2  ;;  %s353_s24 = int_to_ptr.hbm [resolvable:$true] %s352_s24 }
   0x7   :  { %v446_v19 = vld [vmem:[%s689_s5 + $0x8] sm:$0xff]  ;;  %v445_v20 = vld [vmem:[%s689_s5] sm:$0xff]  ;;  %v462_v40 = vld [vmem:[%s695_s11 + $0x38] sm:$0xff] }
   0x8   :  { %v61_v8 = vmul.f32 1.442695, %v60_v7  ;;  %v99_v21 = vld [vmem:[%s688_s4] sm:$0x1]  ;;  %v454_v35 = vld [vmem:[%s692_s8 + $0x8] sm:$0xff]  ;;  %322 = vmatpush.bf16.msra.mxu3 %v462_v40  ;;  %v461_v54 = vld [vmem:[%s695_s11 + $0x30] sm:$0xff] }
   0x9   :  { %v117_v22 = vsub.f32 0.0, %v99_v21  ;;  %v464_v23 = vld [vmem:[%s687_s3] ss:$0 sm:$0xff]  ;;  %235 = vmatpush.bf16.msra.mxu2 %v454_v35  ;;  %v460_v55 = vld [vmem:[%s695_s11 + $0x28] sm:$0xff]  ;;  %v458_v57 = vld [vmem:[%s695_s11 + $0x18] sm:$0xff] }
   0xa   :  { %469 = vpow2.f32 %v61_v8  ;;  %181 = vmatpush.bf16.msra.mxu1 %v450_v15  ;;  %v453_v36 = vld [vmem:[%s692_s8] sm:$0xff]  ;;  %v457_v58 = vld [vmem:[%s695_s11 + $0x10] sm:$0xff]  ;;  %v456_v59 = vld [vmem:[%s695_s11 + $0x8] sm:$0xff] }
   0xb   :  { %v119_v24 = vperm.slane %v117_v22, 0  ;;  %v194_v37 = vld [vmem:[%s691_s7] sm:$0x1] }
   0xc   :  { %v465_v38 = vld [vmem:[%s690_s6] ss:$0 sm:$0xff]  ;;  %v200_v39 = vsub.f32 0.0, %v194_v37  ;;  %323 = vmatpush.bf16.msra.mxu3 %v461_v54 }
   0xd   :  { %236 = vmatpush.bf16.msra.mxu2 %v453_v36  ;;  %v459_v56 = vld [vmem:[%s695_s11 + $0x20] sm:$0xff] }
   0xe   :  { %182 = vmatpush.bf16.msra.mxu1 %v449_v16  ;;  %v202_v44 = vperm.slane %v200_v39, 0  ;;  %v455_v60 = vld [vmem:[%s695_s11] sm:$0xff] }
   0xf   :  { %v242_v61 = vld [vmem:[%s694_s10] sm:$0x1] }
  0x10   :  { %v470_v9 = vpop.eup %469  ;;  %324 = vmatpush.bf16.msra.mxu3 %v460_v55  ;;  %v260_v62 = vsub.f32 0.0, %v242_v61  ;;  %v466_v63 = vld [vmem:[%s693_s9] ss:$0 sm:$0xff] }
  0x11   :  { %v63_v10 = vadd.f32 1.0, %v470_v9  ;;  %v468_v15 = vld [vmem:[%s697_s13] ss:$0 sm:$0xff] }
  0x12   :  { %183 = vmatpush.bf16.msra.mxu1 %v448_v17  ;;  %v262_v0 = vperm.slane %v260_v62, 0 }
  0x13   :  { %471 = vrcp.f32 %v63_v10 }
  0x14   :  { %325 = vmatpush.bf16.msra.mxu3 %v459_v56 }
  0x16   :  { %184 = vmatpush.bf16.msra.mxu1 %v447_v18 }
  0x18   :  { %326 = vmatpush.bf16.msra.mxu3 %v458_v57 }
  0x19   :  { %v472_v11 = vpop.eup %471 }
  0x1a   :  { %v65_v12 = vmul.f32 %v472_v11, %v49_v4  ;;  %185 = vmatpush.bf16.msra.mxu1 %v446_v19  ;;  %v467_v11 = vld [vmem:[%s696_s12] ss:$0 sm:$0xff] }
  0x1c   :  { %v66_v13 = vpack.c.bf16 %v65_v12, %v65_v12  ;;  %327 = vmatpush.bf16.msra.mxu3 %v457_v58 }
  0x1e   :  { %369 = vmatmul.msk.bf16.vlgmr.msra.gmra.mxu0 %vm82_vm0, %v66_v13  ;;  %186 = vmatpush.bf16.msra.mxu1 %v445_v20 }
  0x20   :  { %328 = vmatpush.bf16.msra.mxu3 %v456_v59 }
  0x24   :  { %329 = vmatpush.bf16.msra.mxu3 %v455_v60 }
  0x9b   :  { %v95_v25 = vpop.f32.mrf.mxu0 }
  0x9c   :  { %v96_v26 = vadd.f32 %v464_v23, %v95_v25 }
  0x9e   :  { %v121_v27 = vmul.f32 %v119_v24, %v96_v26 }
  0xa0   :  { %v122_v28 = vmul.f32 1.442695, %v121_v27 }
  0xa2   :  { %473 = vpow2.f32 %v122_v28 }
  0xa3   :  { %v97_v29 = vpop.f32.mrf.mxu0 }
  0xa8   :  { %v474_v30 = vpop.eup %473 }
  0xa9   :  { %v124_v31 = vadd.f32 1.0, %v474_v30 }
  0xab   :  { %475 = vrcp.f32 %v124_v31 }
  0xb1   :  { %v476_v32 = vpop.eup %475 }
  0xb2   :  { %v126_v33 = vmul.f32 %v476_v32, %v96_v26 }
  0xb4   :  { %v127_v34 = vpack.c.bf16 %v126_v33, %v126_v33 }
  0xb6   :  { %187 = vmatmul.bf16.vlgmr.msra.gmra.mxu1 %v127_v34 }
 0x133   :  { %v188_v41 = vpop.f32.mrf.mxu1 }
 0x134   :  { %v189_v42 = vadd.f32 %v465_v38, %v188_v41 }
 0x136   :  { %v192_v43 = vadd.f32 %v189_v42, %v49_v4 }
 0x138   :  { %v193_v45 = vmul.f32 0.70710677, %v192_v43 }
 0x13a   :  { %v204_v46 = vmul.f32 %v202_v44, %v193_v45 }
 0x13b   :  { %v190_v47 = vpop.f32.mrf.mxu1 }
 0x13c   :  { %v205_v48 = vmul.f32 1.442695, %v204_v46 }
 0x13e   :  { %477 = vpow2.f32 %v205_v48 }
 0x144   :  { %v478_v49 = vpop.eup %477 }
 0x145   :  { %v207_v50 = vadd.f32 1.0, %v478_v49 }
 0x147   :  { %479 = vrcp.f32 %v207_v50 }
 0x14d   :  { %v480_v51 = vpop.eup %479 }
 0x14e   :  { %v209_v52 = vmul.f32 %v480_v51, %v193_v45 }
 0x150   :  { %v210_v53 = vpack.c.bf16 %v209_v52, %v209_v52 }
 0x152   :  { %410 = vmatmul.msk.bf16.vlgmr.msra.gmra.mxu2 %vm82_vm0, %v210_v53 }
 0x1d5   :  { %v238_v1 = vpop.f32.mrf.mxu2 }
 0x1d6   :  { %v239_v2 = vadd.f32 %v466_v63, %v238_v1 }
 0x1d8   :  { %v264_v3 = vmul.f32 %v262_v0, %v239_v2 }
 0x1da   :  { %v265_v4 = vmul.f32 1.442695, %v264_v3 }
 0x1dc   :  { %481 = vpow2.f32 %v265_v4 }
 0x1dd   :  { %v240_v5 = vpop.f32.mrf.mxu2 }
 0x1e2   :  { %v482_v6 = vpop.eup %481 }
 0x1e3   :  { %v267_v7 = vadd.f32 1.0, %v482_v6 }
 0x1e5   :  { %483 = vrcp.f32 %v267_v7 }
 0x1eb   :  { %v484_v8 = vpop.eup %483 }
 0x1ec   :  { %v269_v9 = vmul.f32 %v484_v8, %v239_v2 }
 0x1ee   :  { %v270_v10 = vpack.c.bf16 %v269_v9, %v269_v9 }
 0x1f0   :  { %330 = vmatmul.bf16.vlgmr.msra.gmra.mxu3 %v270_v10 }
 0x273   :  { %v331_v12 = vpop.f32.mrf.mxu3 }
 0x274   :  { %v332_v13 = vadd.f32 %v467_v11, %v331_v12 }
 0x276   :  { %v335_v14 = vadd.f32 %v332_v13, %v193_v45 }
 0x278   :  { %v336_v16 = vmul.f32 0.70710677, %v335_v14 }
 0x27a   :  { %v341_v17 = vmul.f32 %v468_v15, %v336_v16 }
 0x27b   :  { %v333_v18 = vpop.f32.mrf.mxu3 }
 0x27c   :  { %485 = vtanh.f32 %v341_v17 }
 0x282   :  { %v486_v19 = vpop.eup %485 }
 0x283   :  { %344 = vst.msk [vmem:[#allocation2] sm:$0x3] %vm343_vm1, %v486_v19 }
 0x284   :  { %355 = dma.vmem_to_hbm [thread:$0]  %s351_s2, 32, %s353_s24, [#allocation3]  }
 0x285   :  { %511 = dma.done.wait [#allocation3], 32  }
 0x286   :  { %512 = vsyncadd [#allocation3], 4294967264 }
 0x287   :  { %360 = vsyncpa [#allocation3], 1 }

</bundles_post_ra>
